<compile_context>
chip_gen: v7x
topology: tpu7x:2x2x1
jax: 0.10.0
libtpu: 0.0.40
codegen_flags: <defaults>
</compile_context>

<pallas_src>
import math
import functools

import jax
import jax.numpy as jnp
from jax.experimental import pallas as pl
from jax.experimental.pallas import tpu as pltpu


def _wavenet_kernel(distinct_dilations, kernel_size, residual_channels, pad,
                    scale_residual,
                    dil_ref,                       # SMEM (L,) int32 (scalar prefetch)
                    x_ref, c_ref, m_ref,           # (Cres,T) f32, (Caux,T) bf16, (1,T)
                    wf_ref, wo_ref, bias_ref,      # (Cgate,K*Cres+Caux) bf16,
                                                   # (Cres+Cskip,Cgate//2+1) bf16,
                                                   # (Cgate,L) f32
                    sout_ref,                      # (Cskip,T)
                    xpad_scr, stk_scr, g_scr, xres_scr, skip_scr):
    """One residual layer `l = program_id(1)` of one batch element `b = program_id(0)`."""
    l = pl.program_id(1)
    n_layers = pl.num_programs(1)
    T = x_ref.shape[-1]
    cres = residual_channels
    K = kernel_size
    half = (K - 1) // 2
    cdt = stk_scr.dtype                       # bf16 matmul-operand dtype
    hg = g_scr.shape[0] - 1                   # gate_channels // 2

    # ---------------- per-batch initialisation (first layer only) ----------------
    @pl.when(l == 0)
    def _init():
        xres_scr[...] = x_ref[...].astype(jnp.float32)   # running residual, f32
        skip_scr[...] = jnp.zeros_like(skip_scr)         # skip accumulator, f32
        xpad_scr[...] = jnp.zeros_like(xpad_scr)         # halo stays 0 == conv zero pad
        stk_scr[K * cres:, :] = c_ref[...]                # aux rows, constant over layers
        g_scr[hg:hg + 1, :] = m_ref[...].astype(cdt)      # mask row (folds bout*mask)

    # -------- refresh the centre of the zero-halo buffer with the residual -------
    xpad_scr[:, pad:pad + T] = xres_scr[...].astype(cdt)

    # -------- gather the K dilated taps (static offsets per distinct dilation) ---
    d = dil_ref[l]

    def _gather_taps(dv):
        for k in range(K):
            off = pad + (k - half) * dv       # static -> static lane slice
            stk_scr[k * cres:(k + 1) * cres, :] = xpad_scr[:, off:off + T]

    if len(distinct_dilations) == 1:
        _gather_taps(distinct_dilations[0])
    else:
        for dv in distinct_dilations:
            pl.when(d == dv)(functools.partial(_gather_taps, dv))

    # -------- dilated conv + aux 1x1 conv as ONE MXU matmul (N = T) ---------------
    z = jnp.dot(wf_ref[...], stk_scr[...], preferred_element_type=jnp.float32)

    # Per-(batch, layer) bias column (conv bias + global conditioning), selected from
    # the lane (layer) axis with a masked reduce: no (C, 1)-padded buffers or DMAs.
    n_l = bias_ref.shape[-1]
    lane = jax.lax.broadcasted_iota(jnp.int32, (z.shape[0], n_l), 1)
    bcol = jnp.sum(jnp.where(lane == l, bias_ref[...], 0.0), axis=1, keepdims=True)
    z = z + bcol

    gated = jnp.tanh(z[:hg]) * jax.nn.sigmoid(z[hg:])     # f32 gating

    # Masked gated activations; row hg of g_scr holds the mask, and the last column of
    # wo holds bout, so the matmul below produces (wo @ gated + bout) * x_mask directly.
    g_scr[:hg, :] = (gated * m_ref[...].astype(jnp.float32)).astype(cdt)

    o = jnp.dot(wo_ref[...], g_scr[...], preferred_element_type=jnp.float32)

    new_x = xres_scr[...] + o[:cres]          # masked res-contribution + unmasked residual
    if scale_residual:
        new_x = new_x * math.sqrt(0.5)
    xres_scr[...] = new_x
    skip_scr[...] = skip_scr[...] + o[cres:]

    @pl.when(l == n_layers - 1)
    def _finish():
        sout_ref[...] = skip_scr[...].astype(sout_ref.dtype)


def _vmem_limit_bytes():
    # Generation-aware VMEM limit (v7x: 64 MiB physical; v5e/v6e: 128 MiB).
    try:
        cap = int(pltpu.get_tpu_info().vmem_capacity_bytes)
        return max(32 * 1024 * 1024, min((cap * 3) // 4, 96 * 1024 * 1024))
    except Exception:
        return 48 * 1024 * 1024


def wavenet_forward(x, x_mask, c, g, layer_params, dilations, kernel_size,
                    scale_residual=False, scale_skip_connect=False,
                    compute_dtype=jnp.bfloat16):
    """WaveNet.forward with use_first_conv=False / use_last_conv=False (defaults).

    layer_params[l] = (wconv (Cgate,Cres,K), bconv (Cgate,), waux (Cgate,Caux),
                       wglo (Cgate,Gch), wout (Cres+Cskip,Cgate//2), bout (Cres+Cskip,))
    """
    # TODO(synk): first_conv / last_conv (1x1 conv stacks) are disabled by the default
    # config and therefore omitted; aux_channels<=0 / global_channels<=0 not handled.
    # TODO(synk): tile the time axis (extra "parallel" grid dim with receptive-field
    # halo recompute) for very long T; the current version keeps full T resident.
    B, Cres, T = x.shape
    Caux = c.shape[1]
    K = kernel_size
    L = len(layer_params)
    Cgate = layer_params[0][0].shape[0]
    Cout = layer_params[0][4].shape[0]
    Cskip = Cout - Cres
    hg = Cgate // 2
    dil = tuple(int(d) for d in dilations)
    half = (K - 1) // 2
    pad = half * max(dil)
    Ck = K * Cres + Caux

    # Fused [conv tap 0 | ... | tap K-1 | aux 1x1] weight, streamed per layer (bf16).
    wf = jnp.stack([
        jnp.concatenate([wc[:, :, k] for k in range(K)] + [wa], axis=1)
        for (wc, _, wa, _, _, _) in layer_params
    ]).astype(compute_dtype)                                       # (L, Cgate, Ck)

    # Output 1x1 weight with bout folded in as the last column (pairs with the mask
    # row appended to the gated activations inside the kernel).
    wo = jnp.stack([
        jnp.concatenate([wout, bout[:, None]], axis=1)
        for (_, _, _, _, wout, bout) in layer_params
    ]).astype(compute_dtype)                                       # (L, Cout, hg+1)

    # Conv bias + global conditioning folded into one per-(batch, layer) column.
    # Layers live on the LANE axis -> no 128x lane-pad blow-up.
    bconv = jnp.stack([p[1] for p in layer_params])                # (L, Cgate)
    wglo = jnp.stack([p[3] for p in layer_params])                 # (L, Cgate, Gch)
    bias = bconv[None] + jnp.einsum("log,bg->blo", wglo, g[:, :, 0])
    bias = jnp.transpose(bias, (0, 2, 1)).astype(jnp.float32)      # (B, Cgate, L)

    dil_arr = jnp.asarray(dil, dtype=jnp.int32)
    c_cd = c.astype(compute_dtype)        # only ever consumed as a bf16 matmul operand

    kern = functools.partial(_wavenet_kernel, tuple(sorted(set(dil))), K, Cres, pad,
                             bool(scale_residual))

    grid_spec = pltpu.PrefetchScalarGridSpec(
        num_scalar_prefetch=1,
        grid=(B, L),
        in_specs=[
            pl.BlockSpec((None, Cres, T), lambda b, l, dil_s: (b, 0, 0)),        # x
            pl.BlockSpec((None, Caux, T), lambda b, l, dil_s: (b, 0, 0)),        # c (bf16)
            pl.BlockSpec((None, 1, T), lambda b, l, dil_s: (b, 0, 0)),           # mask
            pl.BlockSpec((None, Cgate, Ck), lambda b, l, dil_s: (l, 0, 0)),      # wf[l]
            pl.BlockSpec((None, Cout, hg + 1), lambda b, l, dil_s: (l, 0, 0)),   # wo[l]
            pl.BlockSpec((None, Cgate, L), lambda b, l, dil_s: (b, 0, 0)),       # bias[b]
        ],
        out_specs=pl.BlockSpec((None, Cskip, T), lambda b, l, dil_s: (b, 0, 0)),
        scratch_shapes=[
            pltpu.VMEM((Cres, T + 2 * pad), compute_dtype),  # zero-halo residual view
            pltpu.VMEM((Ck, T), compute_dtype),              # stacked matmul-1 operand
            pltpu.VMEM((hg + 1, T), compute_dtype),          # gated*mask rows | mask row
            pltpu.VMEM((Cres, T), jnp.float32),              # running residual (f32)
            pltpu.VMEM((Cskip, T), jnp.float32),             # skip accumulator (f32)
        ],
    )

    skips = pl.pallas_call(
        kern,
        out_shape=jax.ShapeDtypeStruct((B, Cskip, T), x.dtype),
        grid_spec=grid_spec,
        compiler_params=pltpu.CompilerParams(
            dimension_semantics=("parallel", "arbitrary"),
            vmem_limit_bytes=_vmem_limit_bytes()),
    )(dil_arr, x, c_cd, x_mask, wf, wo, bias)

    if scale_skip_connect:
        skips = skips * math.sqrt(1.0 / L)
    return skips


# ---------------------- pure-JAX references (for verification) ----------------------
def wavenet_ref_f32(x, mask, c, g, params, dilations, K, Cres):
    """Full-f32 reference, structurally identical to the torch module."""
    skips = 0.0
    for (wconv, bconv, waux, wglo, wout, bout), d in zip(params, dilations):
        residual = x
        p = (K - 1) // 2 * d
        z = jax.lax.conv_general_dilated(
            x, wconv, window_strides=(1,), padding=[(p, p)], rhs_dilation=(d,),
            dimension_numbers=("NCH", "OIH", "NCH"))
        z = z + bconv.reshape(1, -1, 1)
        z = z + jnp.einsum("oc,bct->bot", waux, c)
        z = z + jnp.einsum("og,bgu->bou", wglo, g)
        cg = z.shape[1]
        h = jnp.tanh(z[:, :cg // 2]) * jax.nn.sigmoid(z[:, cg // 2:])
        o = jnp.einsum("oc,bct->bot", wout, h) + bout.reshape(1, -1, 1)
        o = o * mask
        x = o[:, :Cres] + residual
        skips = skips + o[:, Cres:]
    return skips


def wavenet_ref_bf16(x, mask, c, g, params, dilations, K, Cres):
    """Mirrors the kernel's math exactly (bf16 matmul operands, f32 accumulation,
    f32 bias/gating/residual, bout folded into the second matmul as a bf16 column)."""
    B, _, T = x.shape
    half = (K - 1) // 2
    cb = c.astype(jnp.bfloat16)
    mrow = mask.astype(jnp.bfloat16)
    skips = 0.0
    for (wconv, bconv, waux, wglo, wout, bout), d in zip(params, dilations):
        residual = x
        p = half * d
        xp = jnp.pad(x.astype(jnp.bfloat16), ((0, 0), (0, 0), (p, p)))
        taps = [xp[:, :, k * d:k * d + T] for k in range(K)]
        stacked = jnp.concatenate(taps + [cb], axis=1)
        wf = jnp.concatenate([wconv[:, :, k] for k in range(K)] + [waux],
                             axis=1).astype(jnp.bfloat16)
        z = jnp.einsum("oi,bit->bot", wf, stacked, preferred_element_type=jnp.float32)
        z = z + bconv.reshape(1, -1, 1) + jnp.einsum("og,bgu->bou", wglo, g)
        cg = z.shape[1]
        h = jnp.tanh(z[:, :cg // 2]) * jax.nn.sigmoid(z[:, cg // 2:])
        gm = (h * mask).astype(jnp.bfloat16)
        aug = jnp.concatenate([gm, mrow], axis=1)
        wo_aug = jnp.concatenate([wout, bout[:, None]], axis=1).astype(jnp.bfloat16)
        o = jnp.einsum("oi,bit->bot", wo_aug, aug, preferred_element_type=jnp.float32)
        x = o[:, :Cres] + residual
        skips = skips + o[:, Cres:]
    return skips


def init_params(key, layers, K, Cres, Cgate, Cskip, Caux, Gch):
    """Deterministic synthetic parameters (shapes match the torch module)."""
    params = []
    for i in range(layers):
        k = jax.random.fold_in(key, i)
        k1, k2, k3, k4, k5, k6 = jax.random.split(k, 6)
        wconv = 0.1 * jax.random.normal(k1, (Cgate, Cres, K), jnp.float32)
        bconv = 0.01 * jax.random.normal(k2, (Cgate,), jnp.float32)
        waux = 0.1 * jax.random.normal(k3, (Cgate, Caux), jnp.float32)
        wglo = 0.1 * jax.random.normal(k4, (Cgate, Gch), jnp.float32)
        wout = 0.1 * jax.random.normal(k5, (Cres + Cskip, Cgate // 2), jnp.float32)
        bout = 0.01 * jax.random.normal(k6, (Cres + Cskip,), jnp.float32)
        params.append((wconv, bconv, waux, wglo, wout, bout))
    return params


if __name__ == "__main__":
    # Small but structurally faithful configuration.
    B, T = 2, 128
    Cres, Cgate, Cskip = 32, 64, 32
    Caux, Gch = 16, 8
    K = 3
    layers, stacks, base_dilation = 4, 2, 2
    layers_per_stack = layers // stacks
    dilations = [base_dilation ** (l % layers_per_stack) for l in range(layers)]

    key = jax.random.PRNGKey(0)
    kx, kc, kg, kp = jax.random.split(key, 4)
    x = jax.random.normal(kx, (B, Cres, T), jnp.float32)
    c = jax.random.normal(kc, (B, Caux, T), jnp.float32)
    g = jax.random.normal(kg, (B, Gch, 1), jnp.float32)
    lengths = jnp.array([T, 100], jnp.int32)
    mask = (jnp.arange(T)[None, :] < lengths[:, None]).astype(jnp.float32)[:, None, :]

    params = init_params(kp, layers, K, Cres, Cgate, Cskip, Caux, Gch)

    out = wavenet_forward(x, mask, c, g, params, dilations, K)
    out = jax.block_until_ready(out)
    assert out.shape == (B, Cskip, T)

    # Check against a pure-JAX reference mirroring the kernel's bf16-operand /
    # f32-accumulation math (same math -> tight-ish tolerance).
    ref_b = wavenet_ref_bf16(x, mask, c, g, params, dilations, K, Cres)
    err_b = float(jnp.max(jnp.abs(out - ref_b)))
    assert jnp.allclose(out, ref_b, atol=1e-2, rtol=1e-2), f"bf16-ref max_err={err_b}"

    # Sanity check against the full-f32 (torch-equivalent) forward.
    ref_f = wavenet_ref_f32(x, mask, c, g, params, dilations, K, Cres)
    err_f = float(jnp.max(jnp.abs(out - ref_f)))
    assert err_f < 0.3, f"f32-ref max_err={err_f}"

    print("KERNEL_OK")
</pallas_src>

<mosaic_0001>
module attributes {stable_mosaic.version = 11 : i64} {
  func.func @_wavenet_kernel(%arg0: i32, %arg1: i32, %arg2: memref<4xi32, #tpu.memory_space<smem>>, %arg3: memref<1x32x128xf32, #tpu.memory_space<vmem>>, %arg4: memref<1x16x128xbf16, #tpu.memory_space<vmem>>, %arg5: memref<1x1x128xf32, #tpu.memory_space<vmem>>, %arg6: memref<1x64x112xbf16, #tpu.memory_space<vmem>>, %arg7: memref<1x64x33xbf16, #tpu.memory_space<vmem>>, %arg8: memref<1x64x4xf32, #tpu.memory_space<vmem>>, %arg9: memref<1x32x128xf32, #tpu.memory_space<vmem>>, %arg10: memref<32x132xbf16, #tpu.memory_space<vmem>>, %arg11: memref<112x128xbf16, #tpu.memory_space<vmem>>, %arg12: memref<33x128xbf16, #tpu.memory_space<vmem>>, %arg13: memref<32x128xf32, #tpu.memory_space<vmem>>, %arg14: memref<32x128xf32, #tpu.memory_space<vmem>>) attributes {dimension_semantics = [#tpu.dimension_semantics<parallel>, #tpu.dimension_semantics<arbitrary>], iteration_bounds = array<i64: 2, 4>, scalar_prefetch = 1 : i64, scratch_operands = 5 : i64, tpu.core_type = #tpu.core_type<tc>, window_params = [{transform_indices = @transform_0, window_bounds = array<i64: 1, 32, 128>}, {transform_indices = @transform_1, window_bounds = array<i64: 1, 16, 128>}, {transform_indices = @transform_2, window_bounds = array<i64: 1, 1, 128>}, {transform_indices = @transform_3, window_bounds = array<i64: 1, 64, 112>}, {transform_indices = @transform_4, window_bounds = array<i64: 1, 64, 33>}, {transform_indices = @transform_5, window_bounds = array<i64: 1, 64, 4>}, {transform_indices = @transform_6, window_bounds = array<i64: 1, 32, 128>}]} {
    %c0_i32 = arith.constant 0 : i32
    %0 = arith.cmpi eq, %arg1, %c0_i32 : i32
    %1 = arith.extui %0 : i1 to i32
    %c0_i32_0 = arith.constant 0 : i32
    %2 = arith.cmpi ne, %1, %c0_i32_0 : i32
    scf.if %2 {
      %c0_36 = arith.constant 0 : index
      %c0_37 = arith.constant 0 : index
      %c0_38 = arith.constant 0 : index
      %59 = vector.load %arg3[%c0_36, %c0_37, %c0_38] : memref<1x32x128xf32, #tpu.memory_space<vmem>>, vector<1x32x128xf32>
      %60 = vector.shape_cast %59 : vector<1x32x128xf32> to vector<32x128xf32>
      %c0_39 = arith.constant 0 : index
      %c0_40 = arith.constant 0 : index
      %61 = vector.load %arg13[%c0_39, %c0_40] : memref<32x128xf32, #tpu.memory_space<vmem>>, vector<32x128xf32>
      tpu.vector_store %arg13[%c0_39, %c0_40], %60 {strides = array<i32>} : memref<32x128xf32, #tpu.memory_space<vmem>>, vector<32x128xf32>,
      %cst_41 = arith.constant 0.000000e+00 : f32
      %62 = vector.broadcast %cst_41 : f32 to vector<32x128xf32>
      %c0_42 = arith.constant 0 : index
      %c0_43 = arith.constant 0 : index
      %63 = vector.load %arg14[%c0_42, %c0_43] : memref<32x128xf32, #tpu.memory_space<vmem>>, vector<32x128xf32>
      tpu.vector_store %arg14[%c0_42, %c0_43], %62 {strides = array<i32>} : memref<32x128xf32, #tpu.memory_space<vmem>>, vector<32x128xf32>,
      %cst_44 = arith.constant 0.000000e+00 : bf16
      %64 = vector.broadcast %cst_44 : bf16 to vector<32x132xbf16>
      %c0_45 = arith.constant 0 : index
      %c0_46 = arith.constant 0 : index
      %65 = vector.load %arg10[%c0_45, %c0_46] : memref<32x132xbf16, #tpu.memory_space<vmem>>, vector<32x132xbf16>
      tpu.vector_store %arg10[%c0_45, %c0_46], %64 {strides = array<i32>} : memref<32x132xbf16, #tpu.memory_space<vmem>>, vector<32x132xbf16>,
      %c0_47 = arith.constant 0 : index
      %c0_48 = arith.constant 0 : index
      %c0_49 = arith.constant 0 : index
      %66 = vector.load %arg4[%c0_47, %c0_48, %c0_49] : memref<1x16x128xbf16, #tpu.memory_space<vmem>>, vector<1x16x128xbf16>
      %67 = vector.shape_cast %66 : vector<1x16x128xbf16> to vector<16x128xbf16>
      %c96 = arith.constant 96 : index
      %c0_50 = arith.constant 0 : index
      %68 = vector.load %arg11[%c96, %c0_50] : memref<112x128xbf16, #tpu.memory_space<vmem>>, vector<16x128xbf16>
      tpu.vector_store %arg11[%c96, %c0_50], %67 {strides = array<i32>} : memref<112x128xbf16, #tpu.memory_space<vmem>>, vector<16x128xbf16>,
      %c0_51 = arith.constant 0 : index
      %c0_52 = arith.constant 0 : index
      %c0_53 = arith.constant 0 : index
      %69 = vector.load %arg5[%c0_51, %c0_52, %c0_53] : memref<1x1x128xf32, #tpu.memory_space<vmem>>, vector<1x1x128xf32>
      %70 = vector.shape_cast %69 : vector<1x1x128xf32> to vector<1x128xf32>
      %71 = arith.truncf %70 : vector<1x128xf32> to vector<1x128xbf16>
      %c32 = arith.constant 32 : index
      %c0_54 = arith.constant 0 : index
      %72 = vector.load %arg12[%c32, %c0_54] : memref<33x128xbf16, #tpu.memory_space<vmem>>, vector<1x128xbf16>
      tpu.vector_store %arg12[%c32, %c0_54], %71 {strides = array<i32>} : memref<33x128xbf16, #tpu.memory_space<vmem>>, vector<1x128xbf16>,
    } else {
    }
    %c0 = arith.constant 0 : index
    %c0_1 = arith.constant 0 : index
    %3 = vector.load %arg13[%c0, %c0_1] : memref<32x128xf32, #tpu.memory_space<vmem>>, vector<32x128xf32>
    %4 = arith.truncf %3 : vector<32x128xf32> to vector<32x128xbf16>
    %c0_2 = arith.constant 0 : index
    %c2 = arith.constant 2 : index
    %5 = vector.load %arg10[%c0_2, %c2] : memref<32x132xbf16, #tpu.memory_space<vmem>>, vector<32x128xbf16>
    tpu.vector_store %arg10[%c0_2, %c2], %4 {strides = array<i32>} : memref<32x132xbf16, #tpu.memory_space<vmem>>, vector<32x128xbf16>,
    %6 = arith.index_cast %arg1 : i32 to index
    %7 = memref.load %arg2[%6] : memref<4xi32, #tpu.memory_space<smem>>
    %c1_i32 = arith.constant 1 : i32
    %8 = arith.cmpi eq, %7, %c1_i32 : i32
    %9 = arith.extui %8 : i1 to i32
    %c0_i32_3 = arith.constant 0 : i32
    %10 = arith.cmpi ne, %9, %c0_i32_3 : i32
    scf.if %10 {
      %c0_36 = arith.constant 0 : index
      %c1 = arith.constant 1 : index
      %59 = vector.load %arg10[%c0_36, %c1] : memref<32x132xbf16, #tpu.memory_space<vmem>>, vector<32x128xbf16>
      %c0_37 = arith.constant 0 : index
      %c0_38 = arith.constant 0 : index
      %60 = vector.load %arg11[%c0_37, %c0_38] : memref<112x128xbf16, #tpu.memory_space<vmem>>, vector<32x128xbf16>
      tpu.vector_store %arg11[%c0_37, %c0_38], %59 {strides = array<i32>} : memref<112x128xbf16, #tpu.memory_space<vmem>>, vector<32x128xbf16>,
      %c0_39 = arith.constant 0 : index
      %c2_40 = arith.constant 2 : index
      %61 = vector.load %arg10[%c0_39, %c2_40] : memref<32x132xbf16, #tpu.memory_space<vmem>>, vector<32x128xbf16>
      %c32 = arith.constant 32 : index
      %c0_41 = arith.constant 0 : index
      %62 = vector.load %arg11[%c32, %c0_41] : memref<112x128xbf16, #tpu.memory_space<vmem>>, vector<32x128xbf16>
      tpu.vector_store %arg11[%c32, %c0_41], %61 {strides = array<i32>} : memref<112x128xbf16, #tpu.memory_space<vmem>>, vector<32x128xbf16>,
      %c0_42 = arith.constant 0 : index
      %c3 = arith.constant 3 : index
      %63 = vector.load %arg10[%c0_42, %c3] : memref<32x132xbf16, #tpu.memory_space<vmem>>, vector<32x128xbf16>
      %c64 = arith.constant 64 : index
      %c0_43 = arith.constant 0 : index
      %64 = vector.load %arg11[%c64, %c0_43] : memref<112x128xbf16, #tpu.memory_space<vmem>>, vector<32x128xbf16>
      tpu.vector_store %arg11[%c64, %c0_43], %63 {strides = array<i32>} : memref<112x128xbf16, #tpu.memory_space<vmem>>, vector<32x128xbf16>,
    } else {
    }
    %c2_i32 = arith.constant 2 : i32
    %11 = arith.cmpi eq, %7, %c2_i32 : i32
    %12 = arith.extui %11 : i1 to i32
    %c0_i32_4 = arith.constant 0 : i32
    %13 = arith.cmpi ne, %12, %c0_i32_4 : i32
    scf.if %13 {
      %c0_36 = arith.constant 0 : index
      %c0_37 = arith.constant 0 : index
      %59 = vector.load %arg10[%c0_36, %c0_37] : memref<32x132xbf16, #tpu.memory_space<vmem>>, vector<32x128xbf16>
      %c0_38 = arith.constant 0 : index
      %c0_39 = arith.constant 0 : index
      %60 = vector.load %arg11[%c0_38, %c0_39] : memref<112x128xbf16, #tpu.memory_space<vmem>>, vector<32x128xbf16>
      tpu.vector_store %arg11[%c0_38, %c0_39], %59 {strides = array<i32>} : memref<112x128xbf16, #tpu.memory_space<vmem>>, vector<32x128xbf16>,
      %c0_40 = arith.constant 0 : index
      %c2_41 = arith.constant 2 : index
      %61 = vector.load %arg10[%c0_40, %c2_41] : memref<32x132xbf16, #tpu.memory_space<vmem>>, vector<32x128xbf16>
      %c32 = arith.constant 32 : index
      %c0_42 = arith.constant 0 : index
      %62 = vector.load %arg11[%c32, %c0_42] : memref<112x128xbf16, #tpu.memory_space<vmem>>, vector<32x128xbf16>
      tpu.vector_store %arg11[%c32, %c0_42], %61 {strides = array<i32>} : memref<112x128xbf16, #tpu.memory_space<vmem>>, vector<32x128xbf16>,
      %c0_43 = arith.constant 0 : index
      %c4 = arith.constant 4 : index
      %63 = vector.load %arg10[%c0_43, %c4] : memref<32x132xbf16, #tpu.memory_space<vmem>>, vector<32x128xbf16>
      %c64 = arith.constant 64 : index
      %c0_44 = arith.constant 0 : index
      %64 = vector.load %arg11[%c64, %c0_44] : memref<112x128xbf16, #tpu.memory_space<vmem>>, vector<32x128xbf16>
      tpu.vector_store %arg11[%c64, %c0_44], %63 {strides = array<i32>} : memref<112x128xbf16, #tpu.memory_space<vmem>>, vector<32x128xbf16>,
    } else {
    }
    %c0_5 = arith.constant 0 : index
    %c0_6 = arith.constant 0 : index
    %c0_7 = arith.constant 0 : index
    %14 = vector.load %arg6[%c0_5, %c0_6, %c0_7] : memref<1x64x112xbf16, #tpu.memory_space<vmem>>, vector<1x64x112xbf16>
    %15 = vector.shape_cast %14 : vector<1x64x112xbf16> to vector<64x112xbf16>
    %c0_8 = arith.constant 0 : index
    %c0_9 = arith.constant 0 : index
    %16 = vector.load %arg11[%c0_8, %c0_9] : memref<112x128xbf16, #tpu.memory_space<vmem>>, vector<112x128xbf16>
    %cst = arith.constant dense<0.000000e+00> : vector<64x128xf32>
    %17 = tpu.matmul %15, %16, %cst {dimension_numbers = #tpu.dot_dimension_numbers<[1], [0], [0], [1], [0, 0, 1, 1], [], []>} : vector<64x112xbf16>, vector<112x128xbf16>, vector<64x128xf32> -> vector<64x128xf32>
    %18 = tpu.iota {dimensions = array<i32: 1>} : vector<64x4xi32>
    %19 = vector.broadcast %arg1 : i32 to vector<64x4xi32>
    %20 = arith.cmpi eq, %18, %19 : vector<64x4xi32>
    %c0_10 = arith.constant 0 : index
    %c0_11 = arith.constant 0 : index
    %c0_12 = arith.constant 0 : index
    %21 = vector.load %arg8[%c0_10, %c0_11, %c0_12] : memref<1x64x4xf32, #tpu.memory_space<vmem>>, vector<1x64x4xf32>
    %22 = vector.shape_cast %21 : vector<1x64x4xf32> to vector<64x4xf32>
    %cst_13 = arith.constant 0.000000e+00 : f32
    %23 = vector.broadcast %cst_13 : f32 to vector<64x4xf32>
    %24 = arith.select %20, %22, %23 : vector<64x4xi1>, vector<64x4xf32>
    %cst_14 = arith.constant dense<0.000000e+00> : vector<64xf32>
    %25 = vector.multi_reduction <add>, %24, %cst_14 [1] : vector<64x4xf32> to vector<64xf32>
    %26 = vector.shape_cast %25 : vector<64xf32> to vector<64x1xf32>
    %27 = vector.broadcast %26 : vector<64x1xf32> to vector<64x128xf32>
    %28 = arith.addf %17, %27 : vector<64x128xf32>
    %29 = vector.extract_strided_slice %28 {offsets = [0, 0], sizes = [32, 128], strides = [1, 1]} : vector<64x128xf32> to vector<32x128xf32>
    %30 = math.tanh %29 : vector<32x128xf32>
    %31 = vector.extract_strided_slice %28 {offsets = [32, 0], sizes = [32, 128], strides = [1, 1]} : vector<64x128xf32> to vector<32x128xf32>
    %32 = arith.negf %31 : vector<32x128xf32>
    %33 = math.exp %32 : vector<32x128xf32>
    %cst_15 = arith.constant 1.000000e+00 : f32
    %34 = vector.broadcast %cst_15 : f32 to vector<32x128xf32>
    %35 = arith.addf %34, %33 : vector<32x128xf32>
    %36 = arith.divf %34, %35 : vector<32x128xf32>
    %37 = arith.mulf %30, %36 : vector<32x128xf32>
    %c0_16 = arith.constant 0 : index
    %c0_17 = arith.constant 0 : index
    %c0_18 = arith.constant 0 : index
    %38 = vector.load %arg5[%c0_16, %c0_17, %c0_18] : memref<1x1x128xf32, #tpu.memory_space<vmem>>, vector<1x1x128xf32>
    %39 = vector.shape_cast %38 : vector<1x1x128xf32> to vector<1x128xf32>
    %40 = vector.broadcast %39 : vector<1x128xf32> to vector<32x128xf32>
    %41 = arith.mulf %37, %40 : vector<32x128xf32>
    %42 = arith.truncf %41 : vector<32x128xf32> to vector<32x128xbf16>
    %c0_19 = arith.constant 0 : index
    %c0_20 = arith.constant 0 : index
    %43 = vector.load %arg12[%c0_19, %c0_20] : memref<33x128xbf16, #tpu.memory_space<vmem>>, vector<32x128xbf16>
    tpu.vector_store %arg12[%c0_19, %c0_20], %42 {strides = array<i32>} : memref<33x128xbf16, #tpu.memory_space<vmem>>, vector<32x128xbf16>,
    %c0_21 = arith.constant 0 : index
    %c0_22 = arith.constant 0 : index
    %c0_23 = arith.constant 0 : index
    %44 = vector.load %arg7[%c0_21, %c0_22, %c0_23] : memref<1x64x33xbf16, #tpu.memory_space<vmem>>, vector<1x64x33xbf16>
    %45 = vector.shape_cast %44 : vector<1x64x33xbf16> to vector<64x33xbf16>
    %c0_24 = arith.constant 0 : index
    %c0_25 = arith.constant 0 : index
    %46 = vector.load %arg12[%c0_24, %c0_25] : memref<33x128xbf16, #tpu.memory_space<vmem>>, vector<33x128xbf16>
    %cst_26 = arith.constant dense<0.000000e+00> : vector<64x128xf32>
    %47 = tpu.matmul %45, %46, %cst_26 {dimension_numbers = #tpu.dot_dimension_numbers<[1], [0], [0], [1], [0, 0, 1, 1], [], []>} : vector<64x33xbf16>, vector<33x128xbf16>, vector<64x128xf32> -> vector<64x128xf32>
    %c0_27 = arith.constant 0 : index
    %c0_28 = arith.constant 0 : index
    %48 = vector.load %arg13[%c0_27, %c0_28] : memref<32x128xf32, #tpu.memory_space<vmem>>, vector<32x128xf32>
    %49 = vector.extract_strided_slice %47 {offsets = [0, 0], sizes = [32, 128], strides = [1, 1]} : vector<64x128xf32> to vector<32x128xf32>
    %50 = arith.addf %48, %49 : vector<32x128xf32>
    %c0_29 = arith.constant 0 : index
    %c0_30 = arith.constant 0 : index
    %51 = vector.load %arg13[%c0_29, %c0_30] : memref<32x128xf32, #tpu.memory_space<vmem>>, vector<32x128xf32>
    tpu.vector_store %arg13[%c0_29, %c0_30], %50 {strides = array<i32>} : memref<32x128xf32, #tpu.memory_space<vmem>>, vector<32x128xf32>,
    %c0_31 = arith.constant 0 : index
    %c0_32 = arith.constant 0 : index
    %52 = vector.load %arg14[%c0_31, %c0_32] : memref<32x128xf32, #tpu.memory_space<vmem>>, vector<32x128xf32>
    %53 = vector.extract_strided_slice %47 {offsets = [32, 0], sizes = [32, 128], strides = [1, 1]} : vector<64x128xf32> to vector<32x128xf32>
    %54 = arith.addf %52, %53 : vector<32x128xf32>
    %c0_33 = arith.constant 0 : index
    %c0_34 = arith.constant 0 : index
    %55 = vector.load %arg14[%c0_33, %c0_34] : memref<32x128xf32, #tpu.memory_space<vmem>>, vector<32x128xf32>
    tpu.vector_store %arg14[%c0_33, %c0_34], %54 {strides = array<i32>} : memref<32x128xf32, #tpu.memory_space<vmem>>, vector<32x128xf32>,
    %c3_i32 = arith.constant 3 : i32
    %56 = arith.cmpi eq, %arg1, %c3_i32 : i32
    %57 = arith.extui %56 : i1 to i32
    %c0_i32_35 = arith.constant 0 : i32
    %58 = arith.cmpi ne, %57, %c0_i32_35 : i32
    scf.if %58 {
      %c0_36 = arith.constant 0 : index
      %c0_37 = arith.constant 0 : index
      %59 = vector.load %arg14[%c0_36, %c0_37] : memref<32x128xf32, #tpu.memory_space<vmem>>, vector<32x128xf32>
      %c0_38 = arith.constant 0 : index
      %c0_39 = arith.constant 0 : index
      %c0_40 = arith.constant 0 : index
      %60 = vector.load %arg9[%c0_38, %c0_39, %c0_40] : memref<1x32x128xf32, #tpu.memory_space<vmem>>, vector<1x32x128xf32>
      %61 = vector.shape_cast %60 : vector<1x32x128xf32> to vector<32x128xf32>
      %62 = vector.shape_cast %59 : vector<32x128xf32> to vector<1x32x128xf32>
      tpu.vector_store %arg9[%c0_38, %c0_39, %c0_40], %62 {strides = array<i32>} : memref<1x32x128xf32, #tpu.memory_space<vmem>>, vector<1x32x128xf32>,
    } else {
    }
    return
  }
  func.func @transform_0(%arg0: i32, %arg1: i32, %arg2: memref<4xi32, #tpu.memory_space<smem>>) -> (i32, i32, i32) {
    %c0_i32 = arith.constant 0 : i32
    %c0_i32_0 = arith.constant 0 : i32
    %c0_i32_1 = arith.constant 0 : i32
    return %arg0, %c0_i32, %c0_i32_0 : i32, i32, i32
  }
  func.func @transform_1(%arg0: i32, %arg1: i32, %arg2: memref<4xi32, #tpu.memory_space<smem>>) -> (i32, i32, i32) {
    %c0_i32 = arith.constant 0 : i32
    %c0_i32_0 = arith.constant 0 : i32
    %c0_i32_1 = arith.constant 0 : i32
    return %arg0, %c0_i32, %c0_i32_0 : i32, i32, i32
  }
  func.func @transform_2(%arg0: i32, %arg1: i32, %arg2: memref<4xi32, #tpu.memory_space<smem>>) -> (i32, i32, i32) {
    %c0_i32 = arith.constant 0 : i32
    %c0_i32_0 = arith.constant 0 : i32
    %c0_i32_1 = arith.constant 0 : i32
    return %arg0, %c0_i32, %c0_i32_0 : i32, i32, i32
  }
  func.func @transform_3(%arg0: i32, %arg1: i32, %arg2: memref<4xi32, #tpu.memory_space<smem>>) -> (i32, i32, i32) {
    %c0_i32 = arith.constant 0 : i32
    %c0_i32_0 = arith.constant 0 : i32
    %c0_i32_1 = arith.constant 0 : i32
    return %arg1, %c0_i32, %c0_i32_0 : i32, i32, i32
  }
  func.func @transform_4(%arg0: i32, %arg1: i32, %arg2: memref<4xi32, #tpu.memory_space<smem>>) -> (i32, i32, i32) {
    %c0_i32 = arith.constant 0 : i32
    %c0_i32_0 = arith.constant 0 : i32
    %c0_i32_1 = arith.constant 0 : i32
    return %arg1, %c0_i32, %c0_i32_0 : i32, i32, i32
  }
  func.func @transform_5(%arg0: i32, %arg1: i32, %arg2: memref<4xi32, #tpu.memory_space<smem>>) -> (i32, i32, i32) {
    %c0_i32 = arith.constant 0 : i32
    %c0_i32_0 = arith.constant 0 : i32
    %c0_i32_1 = arith.constant 0 : i32
    return %arg0, %c0_i32, %c0_i32_0 : i32, i32, i32
  }
  func.func @transform_6(%arg0: i32, %arg1: i32, %arg2: memref<4xi32, #tpu.memory_space<smem>>) -> (i32, i32, i32) {
    %c0_i32 = arith.constant 0 : i32
    %c0_i32_0 = arith.constant 0 : i32
    %c0_i32_1 = arith.constant 0 : i32
    return %arg0, %c0_i32, %c0_i32_0 : i32, i32, i32
  }
}

</mosaic_0001>

<bundles_post_ra>
// kernel: tpu_custom_call.1
= control target key start
LH: loop header
LB: loop body
LE: loop exit
PB: predicated region body
PF: predicated region fallthrough
CT: control target
= control target key end

     0   :  { %s1730_s0 = inlined_call_operand.vmem [shape: s32[4], index: 0, kind: input, shape index: {}]   ;;  %s1731_s1 = inlined_call_operand.vmem [shape: f32[2,32,128], index: 1, kind: input, shape index: {}]   ;;  %s1732_s2 = inlined_call_operand.vmem [shape: bf16[2,16,128], index: 2, kind: input, shape index: {}]   ;;  %s1733_s3 = inlined_call_operand.vmem [shape: f32[2,1,128], index: 3, kind: input, shape index: {}]   ;;  %s1734_s4 = inlined_call_operand.vmem [shape: bf16[4,64,112], index: 4, kind: input, shape index: {}]   ;;  %s1735_s5 = inlined_call_operand.vmem [shape: bf16[4,64,33], index: 5, kind: input, shape index: {}]   ;;  %s1736_s6 = inlined_call_operand.vmem [shape: f32[2,64,4], index: 6, kind: input, shape index: {}]   ;;  %s1737_s7 = inlined_call_operand.hbm [shape: f32[2,32,128], index: 7, kind: output, shape index: {}]  }
   0x1   :  { %s12_s26 = sshll.u32 %s1730_s0, 4  ;;  %s13_s26 = int_to_ptr.vmem [resolvable:$true] %s12_s26 }
   0x2   :  { %s1331_s27 = scalar_lea.vmem %s13_s26, 16  ;;  %p1336_p1 = scmp.lt.s32.totalorder %s13_s26, %s13_s26 }
   0x3   :  { %p1332_p0 = scmp.ne.s32.totalorder %s13_s26, %s1331_s27  ;;  %p1337_p2 = scmp.lt.s32.totalorder %s1331_s27, %s1331_s27 }
   0x5   :  { %p1338_p3 = por %p1337_p2, %p1336_p1 }
   0x7   :  { %p1339_p4 = pnand %p1338_p3, %p1332_p0 }
   0x9   :  { %1342 = shalt.err (!%p1339_p4)  }
   0xa   :  { %s1441_s28 = smov [#allocation8]  }
   0xb   :  { %15 = dma.vmem_to_smem %s13_s26, 16, %s1441_s28, [#allocation7] }
   0xc   :  { %1403 = dma.done.wait [#allocation7], 16 }
   0xd   :  { %1404 = vsyncadd [#allocation7], 4294967280 }
   0xe   :  { %17 = sfence }
   0xf   :  { %18 = vsyncpa [#allocation10], 0 }
  0x10   :  { %20 = vsyncpa [#allocation10 + $0x1], 0  ;;  %s1497_s29 = smov 0   ;;  %s1499_s30 = smov 0  }
  0x11   :  { %s1501_s0 = smov 0   ;;  %s1503_s8 = smov 0  }
  0x12   :  { %s1505_s9 = smov 0   ;;  %s1507_s10 = smov 0  }
  0x13   :  { %s1509_s11 = smov 0   ;;  %s1511_s12 = smov 0  }
  0x14 LB: > { %1747 = sst [smem:[#allocation13_spill]] %s1411_s29  ;;  %s1083_s13 = sadd.s32 4294967295, %s1439_s12   ;;  %s1439_s12 = sphi %s1511_s12, %s26_s12   ;;  %s1435_s11 = sphi %s1509_s11, %s1769_s11   ;;  %s1431_s10 = sphi %s1507_s10, %s1768_s10   ;;  %s1427_s9 = sphi %s1505_s9, %s1767_s9   ;;  %s1423_s8 = sphi %s1503_s8, %s1766_s8   ;;  %s1419_s0 = sphi %s1501_s0, %s1765_s0   ;;  %s1415_s30 = sphi %s1499_s30, %s1771_s30   ;;  %s1411_s29 = sphi %s1497_s29, %s1770_s29  }
  0x15   : > { %1748 = sst [smem:[#allocation14_spill]] %s1419_s0  ;;  %s1084_s14 = sadd.s32 4294967294, %s1439_s12  }
  0x16   : > { %1749 = sst [smem:[#allocation15_spill]] %s1431_s10  ;;  %s35_s15 = sadd.s32 1, %s1431_s10 }
  0x17   : > { %1750 = sst [smem:[#allocation16_spill]] %s1435_s11  ;;  %p36_p5 = scmp.ge.s32.totalorder %s35_s15, 4 }
  0x18   : > { %1751 = sst [smem:[#allocation17_spill]] %s1439_s12  ;;  %s38_s16 = sadd.s32 1, %s1435_s11 }
  0x19   : > { %p211_p6 = scmp.ne.s32.totalorder %s1419_s0, %s1415_s30  ;;  %p212_p7 = scmp.eq.s32.totalorder %s1083_s13, 7 }
  0x1a   : > { %s1773_s15 = smov (%p36_p5, %s35_s15), 0  ;;  %s1775_s16 = smov (!%p36_p5, %s38_s16), %s1435_s11 }
  0x1b   : > { %1752 = sst [smem:[#allocation18_spill]] %s1773_s15  ;;  %p1546_p8 = por %p212_p7, %p211_p6 }
  0x1c   : > { %p217_p9 = scmp.ne.s32.totalorder %s1415_s30, %s1411_s29  ;;  %p40_p10 = scmp.ge.s32.totalorder %s1775_s16, 2 }
  0x1d   : > { %p218_p11 = scmp.eq.s32.totalorder %s1084_s14, 7  ;;  %p1087_p12 = scmp.ge.s32.totalorder %s1439_s12, 1 }
  0x1e   : > { %p282_p13 = scmp.lt.s32.totalorder %s1439_s12, 9  ;;  %s1777_s16 = smov (%p40_p10, %s1775_s16), 0 }
  0x1f   : > { %1754 = sst [smem:[#allocation19_spill]] %s1777_s16  ;;  %p1556_p0 = por %p218_p11, %p217_p9 }
  0x20   : > { %p283_p1 = pnand %p1087_p12, %p282_p13  ;;  %s198_s19 = ssub.s32 %s1435_s11, %s1777_s16 }
  0x21   : > { %s1755_s18 = scalar_select %p1556_p0, 1, 0 }
  0x22   : > { %s201_s20 = sadd.s32 1, %s1419_s0  ;;  %p199_p2 = scmp.eq.s32.totalorder %s198_s19, 0 }
  0x23   : > { %1756 = sst [smem:[#allocation20_spill]] %s1755_s18  ;;  %286 = sbr.rel (%p283_p1) target bundleno = 1023 (0x3ff), region = 44 }
  0x24   : > { %s1564_s21 = scalar_select %p199_p2, %s1419_s0, %s201_s20  }
  0x25   : > { %s1741_s22 = sand.u32 (!%p283_p1), 1, %s1415_s30   ;;  %p335_p3 = scmp.lt.s32.totalorder (!%p283_p1), %s1427_s9, 1 }
  0x26   : > { %1757 = sst [smem:[#allocation21_spill]] %s1564_s21  ;;  %s1088_s23 = sshll.u32 (!%p283_p1), %s1741_s22, 5 }
  0x27   : > { %p348_p4 = scmp.lt.s32.totalorder (!%p283_p1), %s1423_s8, 3  ;;  %s1599_s11 = scalar_lea.vmem (!%p283_p1), [#allocation9], %s1088_s23 }
  0x28   : > { %p1099_p5 = scmp.ne.s32.totalorder (!%p283_p1), %s1423_s8, 0 }
  0x2a   : > { %s336_s24 = scalar_select %p335_p3, %s1427_s9, 1 }
  0x2b   : > { %s349_s25 = scalar_select %p348_p4, %s1423_s8, 3 }
  0x2c   : > { %s1137_s26 = sshll.u32 %s336_s24, 5  ;;  %s1138_s27 = sshll.u32 %s336_s24, 3  ;;  %vm381_vm0 = vcmask (!%p1099_p5), 31744   ;;  %v1442_v4 = vmov (!%p1099_p5), 0.0   ;;  %v1443_v5 = vmov (!%p1099_p5), 0   ;;  %vm396_vm1 = vcmask (!%p1099_p5), 1040384  }
  0x2d   : > { %s339_s14 = scalar_lea.vmem %s1731_s1, %s1137_s26  ;;  %s344_s16 = scalar_lea.vmem %s1732_s2, %s1138_s27  ;;  %376 = vst [vmem:[#allocation6] sm:$0xff] (!%p1099_p5), %v1442_v4  ;;  %377 = vst [vmem:[#allocation6 + $0x8] sm:$0xff] (!%p1099_p5), %v1442_v4  ;;  %vm397_vm2 = vsmask.f32 (!%p1099_p5), 256  ;;  %v399_v9 = vld [vmem:[#allocation4 + $0x10] sm:$0x1] (!%p1099_p5) }
  0x2e   : > { %s1582_s10 = scalar_lea.vmem %s1733_s3, %s336_s24  ;;  %s1139_s21 = sshll.u32 %s349_s25, 5  ;;  %v368_v0 = vld [vmem:[%s339_s14] sm:$0xff] (!%p1099_p5)  ;;  %v369_v1 = vld [vmem:[%s339_s14 + $0x8] sm:$0xff] (!%p1099_p5)  ;;  %v370_v2 = vld [vmem:[%s339_s14 + $0x10] sm:$0xff] (!%p1099_p5)  ;;  %378 = vst [vmem:[#allocation6 + $0x10] sm:$0xff] (!%p1099_p5), %v1442_v4 }
  0x2f   : > { %s1587_s18 = scalar_lea.vmem %s1734_s4, %s1139_s21  ;;  %s1592_s28 = scalar_lea.vmem %s1735_s5, %s1139_s21  ;;  %372 = vst [vmem:[#allocation5] sm:$0xff] (!%p1099_p5), %v368_v0  ;;  %373 = vst [vmem:[#allocation5 + $0x8] sm:$0xff] (!%p1099_p5), %v369_v1  ;;  %v371_v3 = vld [vmem:[%s339_s14 + $0x18] sm:$0xff] (!%p1099_p5)  ;;  %v1295_v6 = vld [vmem:[%s344_s16] sm:$0xff] (!%p1099_p5)  }
  0x30   : > { %s1141_s26 = sshll.u32 %s336_s24, 6  ;;  %367 = sbr.rel (%p1099_p5) target bundleno = 55 (0x37), region = 48  ;;  %374 = vst [vmem:[#allocation5 + $0x10] sm:$0xff] (!%p1099_p5), %v370_v2  ;;  %379 = vst [vmem:[#allocation6 + $0x18] sm:$0xff] (!%p1099_p5), %v1442_v4  ;;  %v394_v7 = vld [vmem:[%s1582_s10] sm:$0x1] (!%p1099_p5) }
  0x31   : > { %s1597_s27 = scalar_lea.vmem %s1736_s6, %s1141_s26  ;;  %380 = vst [vmem:[#allocation2] sm:$0xff] (!%p1099_p5), %v1443_v5  ;;  %383 = vst [vmem:[#allocation2 + $0x10] sm:$0xff] (!%p1099_p5), %v1443_v5  ;;  %v395_v8 = vpack.c.bf16 (!%p1099_p5), %v394_v7, %v394_v7 }
  0x32   : > { %382 = vst.msk [vmem:[#allocation2 + $0x8] sm:$0xff] (!%p1099_p5), %vm381_vm0, %v1443_v5  ;;  %384 = vst.msk [vmem:[#allocation2 + $0x18] sm:$0xff] (!%p1099_p5), %vm381_vm0, %v1443_v5 }
  0x33   : > { %375 = vst [vmem:[#allocation5 + $0x18] sm:$0xff] (!%p1099_p5), %v371_v3  ;;  %vm398_vm3 = vmand (!%p1099_p5), %vm396_vm1, %vm397_vm2 }
  0x34   : > { %393 = vst [vmem:[#allocation3 + $0x30] sm:$0xff] (!%p1099_p5), %v1295_v6  ;;  %v400_v10 = vsel (!%p1099_p5), %vm398_vm3, %v395_v8, %v399_v9 }
  0x35   : > { %401 = vst [vmem:[#allocation4 + $0x10] sm:$0x1] (!%p1099_p5), %v400_v10 }
  0x37 PF: > { %v402_v11 = vld [vmem:[#allocation5] sm:$0xff]  ;;  %v403_v12 = vld [vmem:[#allocation5 + $0x8] sm:$0xff]  ;;  %v404_v13 = vld [vmem:[#allocation5 + $0x10] sm:$0xff]  ;;  %s1604_s29 = sld [smem:[#allocation8 + %s1423_s8]]  ;;  %s1444_s0 = smov 2   ;;  %vm416_vm4 = vcmask 1047568  }
  0x38   : > { %v406_v14 = vpack.c.bf16 %v403_v12, %v402_v11  ;;  %vm418_vm5 = vcmask 15360  }
  0x3a   : > { %v405_v15 = vld [vmem:[#allocation5 + $0x18] sm:$0xff]  ;;  %410 = vrot.lane.b32.xlu0 %v406_v14, %s1444_s0 }
  0x3b   : > { %v407_v16 = vpack.c.bf16 %v405_v15, %v404_v13 }
  0x3d   : > { %p1101_p6 = scmp.ne.s32.totalorder %s1604_s29, 1 }
  0x3e   : > { %412 = vrot.lane.b32.xlu0 %v407_v16, %s1444_s0  ;;  %s1445_s12 = smov (!%p1101_p6), 127   ;;  %s1446_s15 = smov (!%p1101_p6), 126   ;;  %vm443_vm6 = vcmask (!%p1101_p6), 1039360   ;;  %vm466_vm7 = vcmask (!%p1101_p6), 1031168   ;;  %vm489_vm8 = vcmask (!%p1101_p6), 1022976  }
  0x3f   : > { %s1447_s16 = smov (!%p1101_p6), 125  }
  0xac   : > { %v411_v17 = vpop.permute.xlu0 %410  ;;  %426 = sbr.rel (%p1101_p6) target bundleno = 322 (0x142), region = 52 }
  0xad   : > { %417 = vst.msk [vmem:[#allocation2] sm:$0xff] %vm416_vm4, %v411_v17 }
  0xae   : > { %419 = vst.msk [vmem:[#allocation2 + $0x8] sm:$0xff] %vm418_vm5, %v411_v17 }
  0xb0   : > { %v413_v18 = vpop.permute.xlu0 %412 }
  0xb1   : > { %420 = vst.msk [vmem:[#allocation2 + $0x10] sm:$0xff] %vm416_vm4, %v413_v18 }
  0xb2   : > { %421 = vst.msk [vmem:[#allocation2 + $0x18] sm:$0xff] %vm418_vm5, %v413_v18 }
  0xb4   : > { %v427_v20 = vld [vmem:[#allocation2] sm:$0xff] }
  0xb5   : > { %435 = vrot.lane.b32.xlu0 %v427_v20, %s1445_s12  ;;  %v428_v22 = vld [vmem:[#allocation2 + $0x8] sm:$0xff] }
  0xb8   : > { %v429_v19 = vld [vmem:[#allocation2 + $0x10] sm:$0xff] }
  0xb9   : > { %439 = vrot.lane.b32.xlu1 %v429_v19, %s1445_s12  ;;  %v430_v21 = vld [vmem:[#allocation2 + $0x18] sm:$0xff]  ;;  %437 = vrot.lane.b32.xlu0 %v428_v22, %s1445_s12 }
  0xbd   : > { %441 = vrot.lane.b32.xlu1 %v430_v21, %s1445_s12  ;;  %458 = vrot.lane.b32.xlu0 %v427_v20, %s1446_s15 }
  0xc1   : > { %460 = vrot.lane.b32.xlu1 %v428_v22, %s1446_s15  ;;  %462 = vrot.lane.b32.xlu0 %v429_v19, %s1446_s15 }
  0xc5   : > { %464 = vrot.lane.b32.xlu1 %v430_v21, %s1446_s15  ;;  %481 = vrot.lane.b32.xlu0 %v427_v20, %s1447_s16 }
  0xc9   : > { %483 = vrot.lane.b32.xlu1 %v428_v22, %s1447_s16  ;;  %485 = vrot.lane.b32.xlu0 %v429_v19, %s1447_s16 }
  0xcd   : > { %487 = vrot.lane.b32.xlu1 %v430_v21, %s1447_s16 }
 0x127   : > { %v436_v24 = vpop.permute.xlu0 %435 }
 0x12b   : > { %v440_v23 = vpop.permute.xlu1 %439  ;;  %v438_v26 = vpop.permute.xlu0 %437 }
 0x12c   : > { %v444_v28 = vsel %vm443_vm6, %v436_v24, %v438_v26 }
 0x12d   : > { %448 = vst [vmem:[#allocation3] sm:$0xff] %v444_v28 }
 0x12f   : > { %v442_v25 = vpop.permute.xlu1 %441  ;;  %v459_v30 = vpop.permute.xlu0 %458 }
 0x130   : > { %v445_v27 = vsel %vm443_vm6, %v440_v23, %v442_v25 }
 0x131   : > { %449 = vst [vmem:[#allocation3 + $0x8] sm:$0xff] %v445_v27 }
 0x133   : > { %v461_v29 = vpop.permute.xlu1 %460  ;;  %v463_v33 = vpop.permute.xlu0 %462 }
 0x134   : > { %v467_v31 = vsel %vm466_vm7, %v459_v30, %v461_v29 }
 0x135   : > { %471 = vst [vmem:[#allocation3 + $0x10] sm:$0xff] %v467_v31 }
 0x137   : > { %v465_v32 = vpop.permute.xlu1 %464  ;;  %v482_v36 = vpop.permute.xlu0 %481 }
 0x138   : > { %v468_v34 = vsel %vm466_vm7, %v463_v33, %v465_v32 }
 0x139   : > { %472 = vst [vmem:[#allocation3 + $0x18] sm:$0xff] %v468_v34 }
 0x13b   : > { %v484_v35 = vpop.permute.xlu1 %483  ;;  %v486_v39 = vpop.permute.xlu0 %485 }
 0x13c   : > { %v490_v37 = vsel %vm489_vm8, %v482_v36, %v484_v35 }
 0x13d   : > { %494 = vst [vmem:[#allocation3 + $0x20] sm:$0xff] %v490_v37 }
 0x13f   : > { %v488_v38 = vpop.permute.xlu1 %487 }
 0x140   : > { %v491_v40 = vsel %vm489_vm8, %v486_v39, %v488_v38 }
 0x141   : > { %495 = vst [vmem:[#allocation3 + $0x28] sm:$0xff] %v491_v40 }
 0x142 PF: > { %p1102_p7 = scmp.ne.s32.totalorder %s1604_s29, 2 }
 0x143   : > { %v504_v42 = vld [vmem:[#allocation2] sm:$0xff] (!%p1102_p7)  ;;  %s1448_s21 = smov (!%p1102_p7), 126   ;;  %s1449_s22 = smov (!%p1102_p7), 124   ;;  %vm520_vm9 = vcmask (!%p1102_p7), 1031168   ;;  %vm543_vm10 = vcmask (!%p1102_p7), 1014784  }
 0x144   : > { %499 = sbr.rel (%p1102_p7) target bundleno = 457 (0x1c9), region = 56  ;;  %512 = vrot.lane.b32.xlu0 (!%p1102_p7), %v504_v42, %s1448_s21  ;;  %502 = vst [vmem:[#allocation3] sm:$0xff] (!%p1102_p7), %v504_v42  ;;  %v505_v44 = vld [vmem:[#allocation2 + $0x8] sm:$0xff] (!%p1102_p7) }
 0x147   : > { %v506_v41 = vld [vmem:[#allocation2 + $0x10] sm:$0xff] (!%p1102_p7) }
 0x148   : > { %516 = vrot.lane.b32.xlu1 (!%p1102_p7), %v506_v41, %s1448_s21  ;;  %503 = vst [vmem:[#allocation3 + $0x8] sm:$0xff] (!%p1102_p7), %v506_v41  ;;  %v507_v43 = vld [vmem:[#allocation2 + $0x18] sm:$0xff] (!%p1102_p7)  ;;  %514 = vrot.lane.b32.xlu0 (!%p1102_p7), %v505_v44, %s1448_s21 }
 0x14c   : > { %518 = vrot.lane.b32.xlu1 %v507_v43, %s1448_s21  ;;  %535 = vrot.lane.b32.xlu0 %v504_v42, %s1449_s22 }
 0x150   : > { %537 = vrot.lane.b32.xlu1 %v505_v44, %s1449_s22  ;;  %539 = vrot.lane.b32.xlu0 %v506_v41, %s1449_s22 }
 0x154   : > { %541 = vrot.lane.b32.xlu1 %v507_v43, %s1449_s22 }
 0x1b6   : > { %v513_v46 = vpop.permute.xlu0 %512 }
 0x1ba   : > { %v517_v45 = vpop.permute.xlu1 %516  ;;  %v515_v48 = vpop.permute.xlu0 %514 }
 0x1bb   : > { %v521_v50 = vsel %vm520_vm9, %v513_v46, %v515_v48 }
 0x1bc   : > { %525 = vst [vmem:[#allocation3 + $0x10] sm:$0xff] %v521_v50 }
 0x1be   : > { %v519_v47 = vpop.permute.xlu1 %518  ;;  %v536_v52 = vpop.permute.xlu0 %535 }
 0x1bf   : > { %v522_v49 = vsel %vm520_vm9, %v517_v45, %v519_v47 }
 0x1c0   : > { %526 = vst [vmem:[#allocation3 + $0x18] sm:$0xff] %v522_v49 }
 0x1c2   : > { %v538_v51 = vpop.permute.xlu1 %537  ;;  %v540_v55 = vpop.permute.xlu0 %539 }
 0x1c3   : > { %v544_v53 = vsel %vm543_vm10, %v536_v52, %v538_v51 }
 0x1c4   : > { %548 = vst [vmem:[#allocation3 + $0x20] sm:$0xff] %v544_v53 }
 0x1c6   : > { %v542_v54 = vpop.permute.xlu1 %541 }
 0x1c7   : > { %v545_v56 = vsel %vm543_vm10, %v540_v55, %v542_v54 }
 0x1c8   : > { %549 = vst [vmem:[#allocation3 + $0x28] sm:$0xff] %v545_v56 }
 0x1c9 PF: > { %v558_v57 = vld [vmem:[#allocation3] sm:$0xff]  ;;  %v565_v59 = vlaneseq  ;;  %v567_v60 = vstv %s1423_s8  ;;  %vm630_vm11 = vcmask 916480   ;;  %v560_v63 = vld [vmem:[#allocation3 + $0x10] sm:$0xff]  ;;  %vm585_vm13 = vcmask 31744   ;;  %v574_v5 = vld [vmem:[%s1597_s27 + $0x28] sm:$0xff]  ;;  %p1131_p9 = scmp.ne.s32.totalorder %s1423_s8, 3 }
 0x1ca   : > { %1176 = vmatprep.subr.bf16.mxu0 %v558_v57  ;;  %v1296_v62 = vld [vmem:[%s1587_s18] sm:$0xff]   ;;  %v575_v2 = vld [vmem:[%s1597_s27 + $0x30] sm:$0xff]  ;;  %v576_v6 = vld [vmem:[%s1597_s27 + $0x38] sm:$0xff]  ;;  %vm819_vm14 = vcmask 269312   ;;  %vm832_vm15 = vcmask 1040384  }
 0x1cb   : > { %1177 = vmatpush3.bf16.msra.mxu0 %v558_v57  ;;  %v566_v61 = vand.u32 127, %v565_v59  ;;  %1190 = vmatprep.mubr.msk.bf16.mxu0 %vm630_vm11, %v1296_v62  ;;  %v573_v1 = vld [vmem:[%s1597_s27 + $0x20] sm:$0xff]  ;;  %v561_v8 = vld [vmem:[#allocation3 + $0x18] sm:$0xff]  ;;  %v570_v13 = vld [vmem:[%s1597_s27 + $0x8] sm:$0xff] }
 0x1cc   : > { %v569_v7 = vld [vmem:[%s1597_s27] sm:$0xff]  ;;  %v571_v18 = vld [vmem:[%s1597_s27 + $0x10] sm:$0xff]  ;;  %v572_v20 = vld [vmem:[%s1597_s27 + $0x18] sm:$0xff] }
 0x1cd   : > { %v559_v58 = vld [vmem:[#allocation3 + $0x8] sm:$0xff]  ;;  %vm1610_vm12 = vcmp.eq.s32.totalorder %v566_v61, %v567_v60  ;;  %v562_v14 = vld [vmem:[#allocation3 + $0x20] sm:$0xff]  ;;  %v564_v28 = vld [vmem:[#allocation3 + $0x30] sm:$0xff] }
 0x1ce   : > { %1178 = vmatprep.subr.bf16.mxu0 %v559_v58  ;;  %v581_v3 = vsel %vm1610_vm12, %v573_v1, 0.0  ;;  %v583_v4 = vsel %vm1610_vm12, %v575_v2, 0.0  ;;  %v582_v11 = vsel %vm1610_vm12, %v574_v5, 0.0  ;;  %v584_v12 = vsel %vm1610_vm12, %v576_v6, 0.0  ;;  %v1297_v29 = vld [vmem:[%s1587_s18 + $0x8] sm:$0xff]   ;;  %v1298_v30 = vld [vmem:[%s1587_s18 + $0x10] sm:$0xff]  }
 0x1cf   : > { %1179 = vmatpush3.bf16.msra.mxu0 %v559_v58  ;;  %v598_v9 = vsel %vm585_vm13, %v581_v3, 0.0  ;;  %v604_v10 = vsel %vm585_vm13, %v583_v4, 0.0  ;;  %v601_v15 = vsel %vm585_vm13, %v582_v11, 0.0  ;;  %v607_v16 = vsel %vm585_vm13, %v584_v12, 0.0  ;;  %v563_v25 = vld [vmem:[#allocation3 + $0x28] sm:$0xff]  ;;  %v1299_v31 = vld [vmem:[%s1587_s18 + $0x18] sm:$0xff]  }
 0x1d0   : > { %1180 = vmatprep.subr.bf16.mxu0 %v560_v63  ;;  %599 = vadd.xlane.f32.xlu0 %v598_v9  ;;  %v577_v17 = vsel %vm1610_vm12, %v569_v7, 0.0  ;;  %v578_v19 = vsel %vm1610_vm12, %v570_v13, 0.0  ;;  %v579_v23 = vsel %vm1610_vm12, %v571_v18, 0.0  ;;  %v580_v24 = vsel %vm1610_vm12, %v572_v20, 0.0  ;;  %v1303_v32 = vld [vmem:[%s1592_s28] sm:$0xff]  }
 0x1d1   : > { %605 = vadd.xlane.f32.xlu1 %v604_v10  ;;  %v586_v21 = vsel %vm585_vm13, %v577_v17, 0.0  ;;  %v589_v22 = vsel %vm585_vm13, %v578_v19, 0.0  ;;  %v592_v26 = vsel %vm585_vm13, %v579_v23, 0.0  ;;  %v595_v27 = vsel %vm585_vm13, %v580_v24, 0.0  ;;  %1204 = vmatprep.mubr.msk.bf16.mxu1 %vm819_vm14, %v1303_v32  ;;  %v1115_v13 = vld [vmem:[%s1582_s10] ss:$0 sm:$0xff] }
 0x1d2   : > { %v1302_v24 = vld [vmem:[#allocation4 + $0x10] ss:$0 sps:$4 sm:$0x11]   ;;  %v1306_v32 = vld [vmem:[%s1592_s28 + $0x18] sm:$0xff]  }
 0x1d3   : > { %1181 = vmatpush3.bf16.msra.mxu0 %v560_v63 }
 0x1d4   : > { %1182 = vmatprep.subr.bf16.mxu0 %v561_v8  ;;  %602 = vadd.xlane.f32.xlu0 %v601_v15 }
 0x1d5   : > { %608 = vadd.xlane.f32.xlu1 %v607_v16 }
 0x1d7   : > { %1183 = vmatpush3.bf16.msra.mxu0 %v561_v8 }
 0x1d8   : > { %1184 = vmatprep.subr.bf16.mxu0 %v562_v14  ;;  %587 = vadd.xlane.f32.xlu0 %v586_v21 }
 0x1d9   : > { %590 = vadd.xlane.f32.xlu1 %v589_v22 }
 0x1db   : > { %1185 = vmatpush3.bf16.msra.mxu0 %v562_v14 }
 0x1dc   : > { %1186 = vmatprep.subr.bf16.mxu0 %v563_v25  ;;  %593 = vadd.xlane.f32.xlu0 %v592_v26  ;;  %v1450_v26 = vmov 0  }
 0x1dd   : > { %596 = vadd.xlane.f32.xlu1 %v595_v27  ;;  %v834_v27 = vsel %vm832_vm15, 65535, %v1450_v26 }
 0x1df   : > { %1187 = vmatpush3.bf16.msra.mxu0 %v563_v25 }
 0x1e0   : > { %1188 = vmatprep.subr.bf16.mxu0 %v564_v28 }
 0x1e3   : > { %1189 = vmatpush3.bf16.msra.mxu0 %v564_v28 }
 0x1e6   : > { %1191 = vmatmul.mubr.msk.bf16.vlgmr.msra.gmra.mrb[0].mxu0 %vm630_vm11, %v1297_v29  ;;  %v836_v29 = vand.u32 %v1302_v24, %v834_v27 }
 0x1e7   : > { %1194 = vmatprep.mubr.msk.bf16.mxu0 %vm630_vm11, %v1298_v30  ;;  %v1304_v30 = vld [vmem:[%s1592_s28 + $0x8] sm:$0xff]  }
 0x1ee   : > { %1195 = vmatmul.mubr.msk.bf16.gmra.mrb[4].mxu0 %vm630_vm11, %v1299_v31  ;;  %v1305_v31 = vld [vmem:[%s1592_s28 + $0x10] sm:$0xff]  }
 0x25d   : > { %v600_v33 = vpop.xlane.xlu0 %599 }
 0x25e   : > { %v606_v34 = vpop.xlane.xlu1 %605 }
 0x261   : > { %v603_v38 = vpop.xlane.xlu0 %602 }
 0x262   : > { %v609_v40 = vpop.xlane.xlu1 %608 }
 0x265   : > { %v588_v42 = vpop.xlane.xlu0 %587 }
 0x266   : > { %v591_v47 = vpop.xlane.xlu1 %590 }
 0x269   : > { %v594_v55 = vpop.xlane.xlu0 %593 }
 0x26a   : > { %v597_v56 = vpop.xlane.xlu1 %596 }
 0x2b9   : > { %v1192_v35 = vpop.f32.mrb[0].mxu0 }
 0x2ba   : > { %v677_v36 = vpop.f32.mrb[1].mxu0  ;;  %v686_v57 = vadd.f32 %v1192_v35, %v594_v55 }
 0x2bb   : > { %v1193_v37 = vpop.f32.mrb[2].mxu0  ;;  %v678_v58 = vadd.f32 %v677_v36, %v588_v42  ;;  %v906_v36 = vld [vmem:[#allocation5 + $0x18] sm:$0xff] }
 0x2bc   : > { %v680_v39 = vpop.f32.mrb[3].mxu0  ;;  %v689_v59 = vadd.f32 %v1193_v37, %v597_v56 }
 0x2bd   : > { %v681_v60 = vadd.f32 %v680_v39, %v591_v47  ;;  %v904_v39 = vld [vmem:[#allocation5 + $0x8] sm:$0xff] }
 0x2c1   : > { %v1196_v41 = vpop.f32.mrb[4].mxu0 }
 0x2c2   : > { %v702_v43 = vadd.f32 %v1196_v41, %v606_v34  ;;  %v693_v44 = vpop.f32.mrb[5].mxu0  ;;  %v903_v34 = vld [vmem:[#allocation5] sm:$0xff] }
 0x2c3   : > { %v694_v45 = vadd.f32 %v693_v44, %v600_v33  ;;  %v1197_v46 = vpop.f32.mrb[6].mxu0  ;;  %v905_v33 = vld [vmem:[#allocation5 + $0x10] sm:$0xff] }
 0x2c4   : > { %v1113_v48 = vmul.f32 -1.442695, %v702_v43  ;;  %v705_v49 = vadd.f32 %v1197_v46, %v609_v40  ;;  %v696_v50 = vpop.f32.mrb[7].mxu0  ;;  %v915_v46 = vld [vmem:[#allocation6] sm:$0xff] }
 0x2c5   : > { %v1111_v51 = vmul.f32 -1.442695, %v694_v45  ;;  %v697_v52 = vadd.f32 %v696_v50, %v603_v38  ;;  %v917_v45 = vld [vmem:[#allocation6 + $0x10] sm:$0xff] }
 0x2c6   : > { %1307 = vpow2.f32 %v1113_v48  ;;  %v1114_v53 = vmul.f32 -1.442695, %v705_v49  ;;  %v918_v48 = vld [vmem:[#allocation6 + $0x18] sm:$0xff] }
 0x2c7   : > { %1309 = vpow2.f32 %v1111_v51  ;;  %v1112_v54 = vmul.f32 -1.442695, %v697_v52  ;;  %v916_v51 = vld [vmem:[#allocation6 + $0x8] sm:$0xff] }
 0x2c8   : > { %1311 = vpow2.f32 %v1114_v53 }
 0x2c9   : > { %1313 = vpow2.f32 %v1112_v54 }
 0x2ca   : > { %1315 = vtanh.f32 %v686_v57 }
 0x2cb   : > { %1317 = vtanh.f32 %v678_v58 }
 0x2cc   : > { %1319 = vtanh.f32 %v689_v59 }
 0x2cd   : > { %1321 = vtanh.f32 %v681_v60 }
 0x2d0   : > { %v1308_v61 = vpop.eup %1307 }
 0x2d1   : > { %v1310_v62 = vpop.eup %1309  ;;  %v726_v63 = vadd.f32 1.0, %v1308_v61 }
 0x2d2   : > { %v1312_v0 = vpop.eup %1311  ;;  %v724_v1 = vadd.f32 1.0, %v1310_v62 }
 0x2d3   : > { %v1314_v2 = vpop.eup %1313  ;;  %1323 = vrcp.f32 %v726_v63  ;;  %v727_v3 = vadd.f32 1.0, %v1312_v0 }
 0x2d4   : > { %1325 = vrcp.f32 %v724_v1  ;;  %v725_v4 = vadd.f32 1.0, %v1314_v2  ;;  %v1316_v5 = vpop.eup %1315 }
 0x2d5   : > { %1327 = vrcp.f32 %v727_v3  ;;  %v1318_v6 = vpop.eup %1317 }
 0x2d6   : > { %1329 = vrcp.f32 %v725_v4  ;;  %v1320_v7 = vpop.eup %1319 }
 0x2d7   : > { %v1322_v8 = vpop.eup %1321 }
 0x2dd   : > { %v1324_v9 = vpop.eup %1323 }
 0x2de   : > { %v1326_v10 = vpop.eup %1325  ;;  %v738_v11 = vmul.f32 %v1324_v9, %v1316_v5 }
 0x2df   : > { %v1328_v12 = vpop.eup %1327  ;;  %v736_v14 = vmul.f32 %v1326_v10, %v1318_v6 }
 0x2e0   : > { %v1330_v15 = vpop.eup %1329  ;;  %v739_v16 = vmul.f32 %v1328_v12, %v1320_v7  ;;  %v749_v18 = vmul.f32 %v1115_v13, %v738_v11 }
 0x2e1   : > { %v737_v17 = vmul.f32 %v1330_v15, %v1322_v8  ;;  %v747_v20 = vmul.f32 %v1115_v13, %v736_v14 }
 0x2e2   : > { %v750_v19 = vmul.f32 %v1115_v13, %v739_v16 }
 0x2e3   : > { %v748_v21 = vmul.f32 %v1115_v13, %v737_v17 }
 0x2e4   : > { %v1155_v22 = vpack.c.bf16 %v750_v19, %v749_v18 }
 0x2e5   : > { %v1150_v23 = vpack.c.bf16 %v748_v21, %v747_v20 }
 0x2e6   : > { %1157 = vst [vmem:[#allocation4 + $0x8] sm:$0xff] %v1155_v22  }
 0x2e7   : > { %1151 = vst [vmem:[#allocation4] sm:$0xff] %v1150_v23  }
 0x2ed   : > { %v1301_v28 = vld [vmem:[#allocation4 + $0x8] sm:$0xff]  }
 0x2ee   : > { %v1300_v25 = vld [vmem:[#allocation4] sm:$0xff]  }
 0x2ef   : > { %1198 = vmatprep.subr.bf16.mxu1 %v1300_v25 }
 0x2f0   : > { %1199 = vmatpush3.bf16.msra.mxu1 %v1300_v25 }
 0x2f1   : > { %1200 = vmatprep.subr.bf16.mxu1 %v1301_v28 }
 0x2f4   : > { %1201 = vmatpush3.bf16.msra.mxu1 %v1301_v28 }
 0x2f5   : > { %1202 = vmatprep.subr.bf16.mxu1 %v836_v29 }
 0x2f8   : > { %1203 = vmatpush3.bf16.msra.mxu1 %v836_v29 }
 0x2fb   : > { %1205 = vmatmul.mubr.msk.bf16.vlgmr.msra.gmra.mrb[0].mxu1 %vm819_vm14, %v1304_v30 }
 0x2fc   : > { %1208 = vmatprep.mubr.msk.bf16.mxu1 %vm819_vm14, %v1305_v31 }
 0x303   : > { %1209 = vmatmul.mubr.msk.bf16.gmra.mrb[4].mxu1 %vm819_vm14, %v1306_v32 }
 0x3ce   : > { %v1206_v35 = vpop.f32.mrb[0].mxu1 }
 0x3cf   : > { %v909_v37 = vadd.f32 %v1206_v35, %v905_v33  ;;  %v872_v38 = vpop.f32.mrb[1].mxu1 }
 0x3d0   : > { %v907_v40 = vadd.f32 %v903_v34, %v872_v38  ;;  %v1207_v41 = vpop.f32.mrb[2].mxu1 }
 0x3d1   : > { %913 = vst [vmem:[#allocation5 + $0x10] sm:$0xff] %v909_v37  ;;  %v910_v42 = vadd.f32 %v1207_v41, %v906_v36  ;;  %v875_v43 = vpop.f32.mrb[3].mxu1 }
 0x3d2   : > { %911 = vst [vmem:[#allocation5] sm:$0xff] %v907_v40  ;;  %v908_v44 = vadd.f32 %v904_v39, %v875_v43 }
 0x3d3   : > { %914 = vst [vmem:[#allocation5 + $0x18] sm:$0xff] %v910_v42 }
 0x3d4   : > { %912 = vst [vmem:[#allocation5 + $0x8] sm:$0xff] %v908_v44 }
 0x3d6   : > { %v1210_v47 = vpop.f32.mrb[4].mxu1  ;;  %930 = sbr.rel (%p1131_p9) target bundleno = 997 (0x3e5), region = 60 }
 0x3d7   : > { %v921_v49 = vadd.f32 %v1210_v47, %v917_v45  ;;  %v888_v50 = vpop.f32.mrb[5].mxu1 }
 0x3d8   : > { %v919_v52 = vadd.f32 %v915_v46, %v888_v50  ;;  %v1211_v53 = vpop.f32.mrb[6].mxu1 }
 0x3d9   : > { %925 = vst [vmem:[#allocation6 + $0x10] sm:$0xff] %v921_v49  ;;  %v922_v54 = vadd.f32 %v1211_v53, %v918_v48  ;;  %v891_v55 = vpop.f32.mrb[7].mxu1 }
 0x3da   : > { %923 = vst [vmem:[#allocation6] sm:$0xff] %v919_v52  ;;  %v920_v56 = vadd.f32 %v916_v51, %v891_v55 }
 0x3db   : > { %926 = vst [vmem:[#allocation6 + $0x18] sm:$0xff] %v922_v54 }
 0x3dc   : > { %924 = vst [vmem:[#allocation6 + $0x8] sm:$0xff] %v920_v56 }
 0x3e0   : > { %v933_v59 = vld [vmem:[#allocation6 + $0x10] sm:$0xff] }
 0x3e1   : > { %v931_v57 = vld [vmem:[#allocation6] sm:$0xff]  ;;  %937 = vst [vmem:[%s1599_s11 + $0x10] sm:$0xff] %v933_v59 }
 0x3e2   : > { %935 = vst [vmem:[%s1599_s11] sm:$0xff] %v931_v57  ;;  %v934_v60 = vld [vmem:[#allocation6 + $0x18] sm:$0xff] }
 0x3e3   : > { %v932_v58 = vld [vmem:[#allocation6 + $0x8] sm:$0xff]  ;;  %938 = vst [vmem:[%s1599_s11 + $0x18] sm:$0xff] %v934_v60 }
 0x3e4   : > { %936 = vst [vmem:[%s1599_s11 + $0x8] sm:$0xff] %v932_v58 }
 0x3e5 PF: > { %s1146_s10 = sshll.u32 %s1427_s9, 9  ;;  %s953_s24 = sshll.u32 %s1599_s11, 4  ;;  %s1674_s24 = int_to_ptr.vmem [resolvable:$true] %s953_s24 }
 0x3e6   : > { %s1671_s23 = scalar_lea.hbm %s1737_s7, %s1146_s10  ;;  %s1760_s25 = sand.u32 1, %s1415_s30  }
 0x3e7   : > { %s1678_s14 = scalar_lea.sflag [#allocation10], %s1760_s25  ;;  %s1343_s20 = scalar_lea.vmem %s1674_s24, 512 }
 0x3e8   : > { %p1344_p10 = scmp.ne.s32.totalorder %s1674_s24, %s1343_s20  ;;  %s1451_s9 = smov [#allocation9]  }
 0x3e9   : > { %s1347_s28 = sshll.u32 %s1451_s9, 4  ;;  %s1348_s28 = int_to_ptr.vmem [resolvable:$false] %s1347_s28 }
 0x3ea   : > { %p1345_p11 = pnand %p1344_p10, %p1546_p8  ;;  %s1349_s26 = scalar_lea.vmem %s1348_s28, 1024 }
 0x3eb   : > { %p1350_p13 = scmp.lt.s32.totalorder %s1674_s24, %s1348_s28  ;;  %p1351_p1 = scmp.lt.s32.totalorder %s1349_s26, %s1343_s20 }
 0x3ec   : > { %p1346_p12 = pneg %p1345_p11 }
 0x3ed   : > { %p1352_p2 = por %p1351_p1, %p1350_p13 }
 0x3ef   : > { %p1353_p3 = pnand %p1352_p2, %p1346_p12 }
 0x3f1   : > { %1356 = shalt.err (!%p1353_p3)
}
 0x3f2   : > { %s1357_s13 = scalar_lea.hbm %s1671_s23, 512  ;;  %s1361_s11 = scalar_lea.hbm %s1737_s7, 1024 }
 0x3f3   : > { %p1358_p4 = scmp.ne.s32.totalorder %s1671_s23, %s1357_s13  ;;  %p1362_p7 = scmp.lt.u32.totalorder %s1671_s23, %s1737_s7 }
 0x3f4   : > { %p1363_p9 = scmp.lt.u32.totalorder %s1361_s11, %s1357_s13  ;;  %p1365_p11 = scmp.lt.u32.totalorder %s1357_s13, %s1671_s23 }
 0x3f5   : > { %p1359_p5 = pnand %p1358_p4, %p1546_p8 }
 0x3f6   : > { %p1364_p10 = por %p1363_p9, %p1362_p7 }
 0x3f7   : > { %p1360_p6 = pneg %p1359_p5 }
 0x3f8   : > { %p1366_p12 = por %p1365_p11, %p1364_p10 }
 0x3fa   : > { %p1367_p13 = pnand %p1366_p12, %p1360_p6 }
 0x3fc   : > { %1370 = shalt.err (!%p1367_p13)
}
 0x3fd   : > { %s1452_s12 = smov 128   ;;  %s1453_s15 = smov 8  }
 0x3fe   : > { %1212 = dma.vmem_to_hbm [thread:$0]  (%p1546_p8), %s1674_s24, 512, %s1671_s23, %s1678_s14, %s1452_s12, %s1452_s12, %s1453_s15  }
 0x3ff PF: > { %s1761_s16 = sld [smem:[#allocation17_spill]]  ;;  %s1762_s21 = sld [smem:[#allocation13_spill]] }
 0x405   : > { %p1218_p1 = scmp.ge.s32.totalorder %s1761_s16, 2  ;;  %s968_s10 = sand.u32 1, %s1762_s21  }
 0x406   : > { %s969_s8 = scalar_lea.sflag [#allocation10], %s968_s10 }
 0x407   : > { %p1215_p2 = pnand %p1218_p1, %p1556_p0 }
 0x409   : > { %1406 = dma.done.wait (!%p1215_p2), %s969_s8, 512  }
 0x40a   : > { %1408 = vsyncadd (!%p1215_p2), %s969_s8, 4294966784  ;;  %s26_s12 = sadd.s32 1, %s1761_s16   ;;  %s1764_s18 = sld [smem:[#allocation14_spill]] }
 0x40b   : > { %p23_p3 = scmp.ge.s32.totalorder %s26_s12, 10   ;;  %s1765_s0 = sld [smem:[#allocation21_spill]] }
 0x40c   : > { %s1766_s8 = sld [smem:[#allocation15_spill]]  ;;  %s1767_s9 = sld [smem:[#allocation16_spill]] }
 0x40d   : > { %s1768_s10 = sld [smem:[#allocation18_spill]]  ;;  %s1769_s11 = sld [smem:[#allocation19_spill]] }
 0x40e   : > { %s1770_s29 = smov %s1415_s30  ;;  %25 = sbr.rel (!%p23_p3) target bundleno = 20 (0x14), region = 110 }
 0x410   : > { %s1771_s30 = smov %s1764_s18 }
 0x415   :  { %974 = vsyncpa [#allocation10], 1 }
 0x416   :  { %976 = vsyncpa [#allocation10 + $0x1], 1 }

</bundles_post_ra>
